<compile_context>
chip_gen: v7x
topology: tpu7x:2x2x1
jax: 0.10.0
libtpu: 0.0.40
codegen_flags: <defaults>
</compile_context>

<pallas_src>
import functools
import math

import jax
import jax.numpy as jnp
from jax.experimental import pallas as pl
from jax.experimental.pallas import tpu as pltpu


def attn_kernel(x_ref, w_ref, b_ref, c_ref, o_ref, *, tb, seq_len, batch, mask_tail):
    """One grid step: TB batch elements.

    x_ref : (TB, L, H)  input slab
    w_ref : (H, A)      Linear weight (pre-transposed), x dtype
    b_ref : (1, A)      Linear bias (f32)
    c_ref : (1, A)      context vector (f32)
    o_ref : (TB, H)     pooled output slab
    """
    x3 = x_ref[...]                              # (TB, L, H), input dtype
    h = x3.shape[-1]
    a = w_ref.shape[-1]

    # Projection: one large (TB*L, H) @ (H, A) MXU matmul, f32 accumulation,
    # tanh on the EUP (its own VLIW slot).
    x2 = x3.reshape(tb * seq_len, h)
    q = jnp.tanh(
        jnp.dot(x2, w_ref[...], preferred_element_type=jnp.float32) + b_ref[...]
    )                                            # (TB*L, A) f32

    # Context scores laid out (TB, L): L on the lane axis -> dense softmax.
    # A is small, so the (TB, L, A) product is tiny next to the x slab.
    scores = jnp.sum(
        q.reshape(tb, seq_len, a) * c_ref[...].reshape(1, 1, a), axis=-1
    )                                            # (TB, L) f32

    if mask_tail:
        # Ragged last block: rows past the true batch were never DMA'd and
        # hold garbage.  Rows never mix in this kernel, so the garbage only
        # reaches output rows that Pallas clips on the store; this mask just
        # keeps the softmax on those rows finite/well-defined.
        row = pl.program_id(0) * tb + jax.lax.broadcasted_iota(
            jnp.int32, (tb, 1), 0
        )
        scores = jnp.where(row < batch, scores, 0.0)

    # Numerically-stable softmax, normalization deferred (flash-style).
    m = jnp.max(scores, axis=-1, keepdims=True)           # (TB, 1)
    e = jnp.exp(scores - m)                               # (TB, L) f32
    denom = jnp.sum(e, axis=-1, keepdims=True)            # (TB, 1)

    # Pooling with the unnormalized weights: one multiply + reduce pass over
    # the slab in f32 (bf16 x is promoted in the multiply), then scale the
    # small (TB, H) result by the reciprocal of the denominator (EUP).
    pooled = jnp.sum(e.reshape(tb, seq_len, 1) * x3, axis=1)   # (TB, H) f32
    o_ref[...] = (pooled * pl.reciprocal(denom, approx=True)).astype(o_ref.dtype)


def _vmem_capacity_bytes():
    """Physical VMEM of the local chip; conservative (v7x) fallback."""
    try:
        return int(pltpu.get_tpu_info().vmem_capacity_bytes)
    except Exception:
        return 64 << 20


def _align_block_b(tb, batch):
    """Clamp TB and keep the (TB, H) output block sublane-legal."""
    tb = max(1, min(int(tb), batch))
    if tb == batch:
        return tb
    if batch >= 8:
        return min(batch, max(8, (tb // 8) * 8))
    return batch


def _choose_block_b(batch, seq_len, hidden, attn, itemsize, vmem_cap):
    """Pick TB from the real VMEM budget (incl. in-kernel f32 temporaries)."""
    per_row = (
        2 * seq_len * hidden * itemsize      # x slab, double-buffered pipeline
        + 2 * seq_len * hidden * 4           # f32 promote + product temporaries
        + 2 * seq_len * attn * 4             # q + score product (f32)
        + hidden * (2 * itemsize + 4)        # out slab (dbl-buffered) + f32 pooled
        + 8 * seq_len                        # scores / exp rows
    )
    budget = vmem_cap // 2                   # headroom for params + Mosaic scratch
    tb = max(1, budget // max(1, per_row))
    # Keep >= 2 grid steps so the 'parallel' batch axis can shard across both
    # TensorCores on v7x; costs at most one ~0.35us step on 1-TC chips.
    if batch >= 16:
        tb = min(tb, pl.cdiv(batch, 2))
    tb = min(tb, batch)
    if tb < batch:
        # Fill the MXU: make TB*L a multiple of 256 when affordable.
        m = 256 // math.gcd(256, seq_len)
        if tb >= m:
            tb = (tb // m) * m
    return tb


def _vmem_limit_bytes(tb, seq_len, hidden, attn, itemsize, vmem_cap):
    """Scoped-VMEM limit: working set incl. f32 temps, capped per generation."""
    x_slab = tb * seq_len * hidden * itemsize
    f32_tmp = 2 * tb * seq_len * hidden * 4            # promote + product
    qa = 2 * tb * seq_len * attn * 4
    out_slab = tb * hidden * itemsize
    params = hidden * attn * itemsize + 4 * attn * 4
    est = (2 * x_slab + f32_tmp + qa + 2 * out_slab
           + tb * hidden * 4 + params + (2 << 20))
    hard_cap = min(int(0.8 * vmem_cap), vmem_cap - (8 << 20))
    return int(max(32 << 20, min(hard_cap, int(est * 1.25))))


def attn_layer(x, weight, bias, context, *, block_b=None, compute_dtype=None):
    """Attention pooling.

    x       : (B, L, H)
    weight  : (A, H)   nn.Linear.weight
    bias    : (A,)     nn.Linear.bias
    context : (A,)
    returns : (B, H)
    """
    B, L, H = x.shape
    A = context.shape[0]

    if compute_dtype is not None and x.dtype != compute_dtype:
        # Optional bandwidth cast (e.g. bf16 on v5e).  Only a net win if the
        # cast fuses into x's producer upstream; left off by default to keep
        # the module's numerics.
        x = x.astype(compute_dtype)
    dtype = x.dtype
    itemsize = jnp.dtype(dtype).itemsize

    vmem_cap = _vmem_capacity_bytes()
    tb = (block_b if block_b is not None
          else _choose_block_b(B, L, H, A, itemsize, vmem_cap))
    tb = _align_block_b(tb, B)
    grid_b = pl.cdiv(B, tb)                      # ragged last block: no jnp.pad

    w_t = weight.T.astype(dtype)                 # (H, A), matmul dtype
    b2 = bias.reshape(1, A).astype(jnp.float32)  # (1, A)
    c2 = context.reshape(1, A).astype(jnp.float32)

    vmem_limit = _vmem_limit_bytes(tb, L, H, A, itemsize, vmem_cap)

    kernel = functools.partial(
        attn_kernel, tb=tb, seq_len=L, batch=B, mask_tail=(B % tb != 0)
    )

    return pl.pallas_call(
        kernel,
        out_shape=jax.ShapeDtypeStruct((B, H), dtype),
        grid_spec=pltpu.PrefetchScalarGridSpec(
            num_scalar_prefetch=0,
            grid=(grid_b,),
            in_specs=[
                pl.BlockSpec((tb, L, H), lambda b: (b, 0, 0)),
                pl.BlockSpec((H, A), lambda b: (0, 0)),
                pl.BlockSpec((1, A), lambda b: (0, 0)),
                pl.BlockSpec((1, A), lambda b: (0, 0)),
            ],
            out_specs=pl.BlockSpec((tb, H), lambda b: (b, 0)),
        ),
        compiler_params=pltpu.CompilerParams(
            dimension_semantics=("parallel",),
            vmem_limit_bytes=vmem_limit,
        ),
    )(x, w_t, b2, c2)


def attn_layer_ref(x, weight, bias, context):
    """Pure-JAX reference matching the PyTorch forward."""
    query = jnp.tanh(jnp.einsum("blh,ah->bla", x, weight) + bias)
    scores = jnp.einsum("bla,a->bl", query, context)
    scores = jax.nn.softmax(scores, axis=-1)
    return jnp.einsum("bl,blh->bh", scores, x)


if __name__ == "__main__":
    key = jax.random.PRNGKey(0)

    # Shapes consistent with the module: batch=2, max_len=8, hidden=32, attn=16.
    B, L, H, A = 2, 8, 32, 16
    kx, kw, kb, kc = jax.random.split(key, 4)
    x = jax.random.normal(kx, (B, L, H), dtype=jnp.float32)
    weight = jax.random.normal(kw, (A, H), dtype=jnp.float32) * 0.1   # Linear.weight
    bias = jax.random.normal(kb, (A,), dtype=jnp.float32) * 0.1       # Linear.bias
    context = jax.random.normal(kc, (A,), dtype=jnp.float32)          # context vector

    out = jax.block_until_ready(attn_layer(x, weight, bias, context))
    ref = attn_layer_ref(x, weight, bias, context)
    assert out.shape == (B, H)
    # approx=True reciprocal (EUP) trades a few ulps for a free divide.
    assert jnp.allclose(out, ref, atol=5e-3, rtol=5e-3), "f32 mismatch vs reference"

    # Larger batch, auto-chosen TB (>= 2 grid steps so a 2-TC chip shards it).
    B2 = 32
    x2 = jax.random.normal(jax.random.fold_in(kx, 1), (B2, L, H), dtype=jnp.float32)
    out2 = jax.block_until_ready(attn_layer(x2, weight, bias, context))
    ref2 = attn_layer_ref(x2, weight, bias, context)
    assert out2.shape == (B2, H)
    assert jnp.allclose(out2, ref2, atol=5e-3, rtol=5e-3), "batched mismatch vs reference"

    # Non-divisible batch: ragged last block handled in-kernel, no pad pass over x.
    B3 = 13
    x_rag = jax.random.normal(jax.random.fold_in(kx, 2), (B3, L, H), dtype=jnp.float32)
    out3 = jax.block_until_ready(attn_layer(x_rag, weight, bias, context, block_b=8))
    ref3 = attn_layer_ref(x_rag, weight, bias, context)
    assert out3.shape == (B3, H)
    assert jnp.allclose(out3, ref3, atol=5e-3, rtol=5e-3), "ragged-batch mismatch vs reference"

    # bf16 x/W traffic (halves the bandwidth-bound x stream); math stays f32.
    x2_bf = x2.astype(jnp.bfloat16)
    w_bf = weight.astype(jnp.bfloat16)
    out_bf = jax.block_until_ready(attn_layer(x2_bf, w_bf, bias, context, block_b=8))
    ref_bf = attn_layer_ref(x2_bf.astype(jnp.float32), w_bf.astype(jnp.float32),
                            bias, context)
    assert jnp.allclose(out_bf.astype(jnp.float32), ref_bf, atol=2e-2, rtol=2e-2), \
        "bf16 mismatch vs reference"

    print("KERNEL_OK")
</pallas_src>

<mosaic_0001>
module attributes {stable_mosaic.version = 11 : i64} {
  func.func @attn_kernel(%arg0: i32, %arg1: memref<2x8x32xf32, #tpu.memory_space<vmem>>, %arg2: memref<32x16xf32, #tpu.memory_space<vmem>>, %arg3: memref<1x16xf32, #tpu.memory_space<vmem>>, %arg4: memref<1x16xf32, #tpu.memory_space<vmem>>, %arg5: memref<2x32xf32, #tpu.memory_space<vmem>>) attributes {dimension_semantics = [#tpu.dimension_semantics<parallel>], iteration_bounds = array<i64: 1>, scalar_prefetch = 0 : i64, scratch_operands = 0 : i64, tpu.core_type = #tpu.core_type<tc>, window_params = [{transform_indices = @transform_0, window_bounds = array<i64: 2, 8, 32>}, {pipeline_mode = #tpu.pipeline_mode<synchronous>, transform_indices = @transform_1, window_bounds = array<i64: 32, 16>}, {pipeline_mode = #tpu.pipeline_mode<synchronous>, transform_indices = @transform_2, window_bounds = array<i64: 1, 16>}, {pipeline_mode = #tpu.pipeline_mode<synchronous>, transform_indices = @transform_3, window_bounds = array<i64: 1, 16>}, {transform_indices = @transform_4, window_bounds = array<i64: 2, 32>}]} {
    %c0 = arith.constant 0 : index
    %c0_0 = arith.constant 0 : index
    %c0_1 = arith.constant 0 : index
    %0 = vector.load %arg1[%c0, %c0_0, %c0_1] : memref<2x8x32xf32, #tpu.memory_space<vmem>>, vector<2x8x32xf32>
    %1 = vector.shape_cast %0 : vector<2x8x32xf32> to vector<16x32xf32>
    %c0_2 = arith.constant 0 : index
    %c0_3 = arith.constant 0 : index
    %2 = vector.load %arg2[%c0_2, %c0_3] : memref<32x16xf32, #tpu.memory_space<vmem>>, vector<32x16xf32>
    %cst = arith.constant dense<0.000000e+00> : vector<16x16xf32>
    %3 = tpu.matmul %1, %2, %cst {dimension_numbers = #tpu.dot_dimension_numbers<[1], [0], [0], [1], [0, 0, 1, 1], [], []>} : vector<16x32xf32>, vector<32x16xf32>, vector<16x16xf32> -> vector<16x16xf32>
    %c0_4 = arith.constant 0 : index
    %c0_5 = arith.constant 0 : index
    %4 = vector.load %arg3[%c0_4, %c0_5] : memref<1x16xf32, #tpu.memory_space<vmem>>, vector<1x16xf32>
    %5 = vector.broadcast %4 : vector<1x16xf32> to vector<16x16xf32>
    %6 = arith.addf %3, %5 : vector<16x16xf32>
    %7 = math.tanh %6 : vector<16x16xf32>
    %8 = vector.shape_cast %7 : vector<16x16xf32> to vector<2x8x16xf32>
    %c0_6 = arith.constant 0 : index
    %c0_7 = arith.constant 0 : index
    %9 = vector.load %arg4[%c0_6, %c0_7] : memref<1x16xf32, #tpu.memory_space<vmem>>, vector<1x16xf32>
    %10 = vector.shape_cast %9 : vector<1x16xf32> to vector<1x1x16xf32>
    %11 = vector.broadcast %10 : vector<1x1x16xf32> to vector<2x8x16xf32>
    %12 = arith.mulf %8, %11 : vector<2x8x16xf32>
    %cst_8 = arith.constant dense<0.000000e+00> : vector<2x8xf32>
    %13 = vector.multi_reduction <add>, %12, %cst_8 [2] : vector<2x8x16xf32> to vector<2x8xf32>
    %cst_9 = arith.constant dense<0xFF800000> : vector<2xf32>
    %14 = vector.multi_reduction <maximumf>, %13, %cst_9 [1] : vector<2x8xf32> to vector<2xf32>
    %15 = vector.shape_cast %14 : vector<2xf32> to vector<2x1xf32>
    %16 = vector.broadcast %15 : vector<2x1xf32> to vector<2x8xf32>
    %17 = arith.subf %13, %16 : vector<2x8xf32>
    %18 = math.exp %17 : vector<2x8xf32>
    %cst_10 = arith.constant dense<0.000000e+00> : vector<2xf32>
    %19 = vector.multi_reduction <add>, %18, %cst_10 [1] : vector<2x8xf32> to vector<2xf32>
    %20 = vector.shape_cast %19 : vector<2xf32> to vector<2x1xf32>
    %21 = vector.shape_cast %18 : vector<2x8xf32> to vector<2x8x1xf32>
    %22 = vector.broadcast %21 : vector<2x8x1xf32> to vector<2x8x32xf32>
    %23 = arith.mulf %22, %0 : vector<2x8x32xf32>
    %cst_11 = arith.constant dense<0.000000e+00> : vector<2x32xf32>
    %24 = vector.multi_reduction <add>, %23, %cst_11 [1] : vector<2x8x32xf32> to vector<2x32xf32>
    %25 = tpu.reciprocal %20 {approx = true} : vector<2x1xf32> -> vector<2x1xf32>
    %26 = vector.broadcast %25 : vector<2x1xf32> to vector<2x32xf32>
    %27 = arith.mulf %24, %26 : vector<2x32xf32>
    %c0_12 = arith.constant 0 : index
    %c0_13 = arith.constant 0 : index
    %28 = vector.load %arg5[%c0_12, %c0_13] : memref<2x32xf32, #tpu.memory_space<vmem>>, vector<2x32xf32>
    tpu.vector_store %arg5[%c0_12, %c0_13], %27 {strides = array<i32>} : memref<2x32xf32, #tpu.memory_space<vmem>>, vector<2x32xf32>,
    return
  }
  func.func @transform_0(%arg0: i32) -> (i32, i32, i32) {
    %c0_i32 = arith.constant 0 : i32
    %c0_i32_0 = arith.constant 0 : i32
    %c0_i32_1 = arith.constant 0 : i32
    return %arg0, %c0_i32, %c0_i32_0 : i32, i32, i32
  }
  func.func @transform_1(%arg0: i32) -> (i32, i32) {
    %c0_i32 = arith.constant 0 : i32
    %c0_i32_0 = arith.constant 0 : i32
    %c0_i32_1 = arith.constant 0 : i32
    return %c0_i32, %c0_i32_0 : i32, i32
  }
  func.func @transform_2(%arg0: i32) -> (i32, i32) {
    %c0_i32 = arith.constant 0 : i32
    %c0_i32_0 = arith.constant 0 : i32
    %c0_i32_1 = arith.constant 0 : i32
    return %c0_i32, %c0_i32_0 : i32, i32
  }
  func.func @transform_3(%arg0: i32) -> (i32, i32) {
    %c0_i32 = arith.constant 0 : i32
    %c0_i32_0 = arith.constant 0 : i32
    %c0_i32_1 = arith.constant 0 : i32
    return %c0_i32, %c0_i32_0 : i32, i32
  }
  func.func @transform_4(%arg0: i32) -> (i32, i32) {
    %c0_i32 = arith.constant 0 : i32
    %c0_i32_0 = arith.constant 0 : i32
    return %arg0, %c0_i32 : i32, i32
  }
}

</mosaic_0001>

<bundles_post_ra>
// kernel: tpu_custom_call.1
= control target key start
LH: loop header
LB: loop body
LE: loop exit
PB: predicated region body
PF: predicated region fallthrough
CT: control target
= control target key end

     0   :  { %vm31_vm0 = vcmask 261120   ;;  %s377_s0 = inlined_call_operand.vmem [shape: f32[2,8,32], index: 0, kind: input, shape index: {}]   ;;  %s378_s1 = inlined_call_operand.vmem [shape: f32[32,16], index: 1, kind: input, shape index: {}]   ;;  %s379_s2 = inlined_call_operand.vmem [shape: f32[1,16], index: 2, kind: input, shape index: {}]   ;;  %s380_s3 = inlined_call_operand.vmem [shape: f32[1,16], index: 3, kind: input, shape index: {}]   ;;  %s381_s4 = inlined_call_operand.hbm [shape: f32[2,32], index: 4, kind: output, shape index: {}]  }
   0x1   :  { %v20_v0 = vld [vmem:[%s378_s1] sm:$0xff]  ;;  %v21_v1 = vld [vmem:[%s378_s1 + $0x8] sm:$0xff]  ;;  %v22_v2 = vld [vmem:[%s378_s1 + $0x10] sm:$0xff] }
   0x2   :  { %v255_v3 = vpack.c.bf16 %v21_v1, %v20_v0  ;;  %v23_v4 = vld [vmem:[%s378_s1 + $0x18] sm:$0xff]  ;;  %v343_v5 = vld [vmem:[%s377_s0] sm:$0xff] }
   0x3   :  { %v259_v6 = vpack.c.bf16 %v23_v4, %v22_v2  ;;  %252 = vmatprep.mubr.msk.f32.mxu0 %vm31_vm0, %v343_v5 }
   0x4   :  { %9 = vsyncpa [#allocation3], 0  ;;  %256 = vmatprep.subr.bf16.mxu0 %v255_v3  ;;  %v19_v7 = vld [vmem:[%s377_s0 + $0x8] sm:$0xff]  ;;  %v234_v8 = vld [vmem:[%s379_s2] ss:$0 sm:$0xff]  ;;  %vm124_vm1 = vcmask 130048   ;;  %v133_v20 = vlaneseq }
   0x5   :  { %258 = vmatpush3.bf16.msra.mxu0 %v255_v3  ;;  %v237_v13 = vld [vmem:[%s380_s3] ss:$0 sm:$0xff]  ;;  %vm143_vm2 = vcmask 1041409   ;;  %vm146_vm3 = vcmask 58368   ;;  %v301_v30 = vmov 0   ;;  %s302_s0 = smov [#allocation2]  }
   0x6   :  { %260 = vmatprep.subr.bf16.mxu0 %v259_v6  ;;  %v134_v21 = vand.u32 127, %v133_v20  ;;  %v136_v22 = vshrl.u32 %v133_v20, 7  ;;  %266 = vset.pattern.permute.xlu0 %v301_v30  ;;  %s226_s2 = sshll.u32 %s302_s0, 4  ;;  %vm218_vm4 = vcmask 254976   ;;  %s227_s2 = int_to_ptr.vmem [resolvable:$true] %s226_s2 }
   0x7   :  { %265 = vset.pattern.permute.xlu1 %v301_v30  ;;  %s277_s3 = scalar_lea.vmem %s227_s2, 32  ;;  %p282_p1 = scmp.lt.s32.totalorder %s227_s2, %s227_s2 }
   0x8   :  { %v137_v24 = vsub.s32 %v134_v21, %v136_v22  ;;  %v153_v31 = vsub.s32 0, %v136_v22  ;;  %v157_v32 = vsub.s32 1, %v136_v22  ;;  %p278_p0 = scmp.ne.s32.totalorder %s227_s2, %s277_s3  ;;  %p283_p2 = scmp.lt.s32.totalorder %s277_s3, %s277_s3 }
   0x9   :  { %262 = vmatpush3.bf16.msra.mxu0 %v259_v6 }
   0xa   :  { %p284_p3 = por %p283_p2, %p282_p1 }
   0xc   :  { %253 = vmatmul.mubr.msk.f32.vlgmr.msra.gmra.mrb[0].mxu0 %vm31_vm0, %v19_v7  ;;  %p285_p4 = pnand %p284_p3, %p278_p0 }
  0xdf   :  { %v254_v9 = vpop.f32.mrb[0].mxu0 }
  0xe0   :  { %v110_v10 = vadd.f32 %v254_v9, %v234_v8  ;;  %v104_v11 = vpop.f32.mrb[1].mxu0 }
  0xe1   :  { %v105_v12 = vadd.f32 %v234_v8, %v104_v11 }
  0xe2   :  { %267 = vtanh.f32 %v110_v10 }
  0xe3   :  { %269 = vtanh.f32 %v105_v12 }
  0xec   :  { %v268_v14 = vpop.eup %267 }
  0xed   :  { %v270_v15 = vpop.eup %269  ;;  %v123_v18 = vmul.f32 %v268_v14, %v237_v13 }
  0xee   :  { %v122_v16 = vmul.f32 %v270_v15, %v237_v13 }
  0xef   :  { %v128_v19 = vsel %vm124_vm1, %v123_v18, 0.0 }
  0xf0   :  { %v125_v17 = vsel %vm124_vm1, %v122_v16, 0.0 }
  0xf1   :  { %126 = vadd.xlane.f32.xlu0 %v125_v17 }
  0xf5   :  { %129 = vadd.xlane.f32.xlu0 %v128_v19 }
 0x17e   :  { %v127_v23 = vpop.xlane.xlu0 %126 }
 0x17f   :  { %v138_v26 = vrot.slane %v127_v23, %v137_v24 }
 0x182   :  { %v130_v25 = vpop.xlane.xlu0 %129 }
 0x183   :  { %v142_v27 = vrot.slane %v130_v25, %v137_v24 }
 0x185   :  { %v144_v28 = vsel %vm143_vm2, %v142_v27, %v138_v26 }
 0x186   :  { %v147_v29 = vsel %vm146_vm3, %v144_v28, -inf }
 0x187   :  { %148 = vmax.xlane.f32.xlu1 %v147_v29 }
 0x214   :  { %v149_v33 = vpop.xlane.xlu1 %148 }
 0x215   :  { %v154_v34 = vrot.slane %v149_v33, %v153_v31  ;;  %v158_v35 = vrot.slane %v149_v33, %v157_v32 }
 0x217   :  { %v161_v36 = vsub.f32 %v127_v23, %v154_v34  ;;  %v162_v37 = vsub.f32 %v130_v25, %v158_v35 }
 0x219   :  { %v163_v38 = vmul.f32 1.442695, %v161_v36  ;;  %v165_v39 = vmul.f32 1.442695, %v162_v37 }
 0x21b   :  { %271 = vpow2.f32 %v163_v38 }
 0x21c   :  { %273 = vpow2.f32 %v165_v39 }
 0x225   :  { %v272_v40 = vpop.eup %271 }
 0x226   :  { %v274_v41 = vpop.eup %273  ;;  %170 = vperm.xlu1 %265, %v272_v40  }
 0x227   :  { %173 = vperm.xlu0 %266, %v274_v41  }
 0x2a5   :  { %v171_v42 = vpop.permute.xlu1 %170 }
 0x2a6   :  { %v174_v43 = vpop.permute.xlu0 %173  ;;  %v178_v44 = vrot.slane %v171_v42, %v137_v24  ;;  %v190_v49 = vmul.f32 %v171_v42, %v343_v5 }
 0x2a7   :  { %v182_v45 = vrot.slane %v174_v43, %v137_v24  ;;  %v191_v48 = vmul.f32 %v174_v43, %v19_v7 }
 0x2a8   :  { %v192_v51 = vsel %vm31_vm0, %v190_v49, 0.0 }
 0x2a9   :  { %v183_v46 = vsel %vm143_vm2, %v182_v45, %v178_v44  ;;  %v199_v50 = vsel %vm31_vm0, %v191_v48, 0.0  ;;  %v193_v53 = vrot.slane %v192_v51, 4 }
 0x2aa   :  { %v185_v47 = vsel %vm146_vm3, %v183_v46, 0.0  ;;  %v200_v52 = vrot.slane %v199_v50, 4 }
 0x2ab   :  { %186 = vadd.xlane.f32.xlu1 %v185_v47  ;;  %v194_v55 = vadd.f32 %v193_v53, %v192_v51 }
 0x2ac   :  { %v201_v54 = vadd.f32 %v200_v52, %v199_v50 }
 0x2ad   :  { %v195_v58 = vrot.slane %v194_v55, 2 }
 0x2ae   :  { %v202_v56 = vrot.slane %v201_v54, 2 }
 0x2af   :  { %v196_v60 = vadd.f32 %v195_v58, %v194_v55 }
 0x2b0   :  { %v203_v59 = vadd.f32 %v202_v56, %v201_v54 }
 0x2b1   :  { %v197_v62 = vrot.slane %v196_v60, 1 }
 0x2b2   :  { %v204_v61 = vrot.slane %v203_v59, 1 }
 0x2b3   :  { %v198_v2 = vadd.f32 %v197_v62, %v196_v60 }
 0x2b4   :  { %v205_v0 = vadd.f32 %v204_v61, %v203_v59 }
 0x338   :  { %v187_v57 = vpop.xlane.xlu1 %186 }
 0x339   :  { %275 = vrcp.f32 %v187_v57 }
 0x343   :  { %v276_v63 = vpop.eup %275 }
 0x344   :  { %v208_v1 = vrot.slane %v276_v63, 1  ;;  %v211_v4 = vmul.f32 %v276_v63, %v198_v2 }
 0x346   :  { %v212_v3 = vmul.f32 %v208_v1, %v205_v0 }
 0x348   :  { %v215_v5 = vrot.slane %v212_v3, 7 }
 0x34a   :  { %v216_v6 = vsel %vm143_vm2, %v215_v5, %v211_v4 }
 0x34b   :  { %219 = vst.msk [vmem:[#allocation2] sm:$0x3] %vm218_vm4, %v216_v6 }
 0x34c   :  { %288 = shalt.err (!%p285_p4)
}
 0x34d   :  { %s289_s6 = scalar_lea.hbm %s381_s4, 32 }
 0x34e   :  { %p290_p5 = scmp.ne.s32.totalorder %s381_s4, %s289_s6  ;;  %p293_p6 = scmp.lt.u32.totalorder %s289_s6, %s381_s4 }
 0x350   :  { %p295_p7 = pnand %p293_p6, %p290_p5 }
 0x352   :  { %298 = shalt.err (!%p295_p7)
}
 0x353   :  { %229 = dma.vmem_to_hbm [thread:$0]  %s227_s2, 32, %s381_s4, [#allocation3]  }
 0x354   :  { %299 = dma.done.wait [#allocation3], 32  }
 0x355   :  { %300 = vsyncadd [#allocation3], 4294967264 }
 0x356   :  { %233 = vsyncpa [#allocation3], 1 }

</bundles_post_ra>
